<compile_context>
chip_gen: v7x
topology: tpu7x:2x2x1
jax: 0.10.0
libtpu: 0.0.40
codegen_flags: <defaults>
</compile_context>

<pallas_src>
import functools

import jax
import jax.numpy as jnp
from jax.experimental import pallas as pl
from jax.experimental.pallas import tpu as pltpu


# ----------------------------------------------------------------------------------
# Kernel: one MXU GEMM + bias + ReLU.  Same body for the gridless and gridded paths.
# ----------------------------------------------------------------------------------
def gemm_bias_relu_kernel(p_ref, w_ref, b_ref, o_ref):
    # p_ref: (tm_or_M, K)   im2col patches (row tile), K = Cin*KH*KW = 400
    # w_ref: (K, CoutP)     flattened + lane-padded filter bank (resident)
    # b_ref: (1, CoutP)     lane-padded bias
    # o_ref: (tm_or_M, CoutP)
    acc = jnp.dot(p_ref[...], w_ref[...], preferred_element_type=jnp.float32)
    acc = acc + b_ref[...]                      # (1, CoutP) broadcasts over rows
    o_ref[...] = jnp.maximum(acc, 0.0).astype(o_ref.dtype)


# ----------------------------------------------------------------------------------
# One-time parameter preparation (hoisted out of the per-call path).
# ----------------------------------------------------------------------------------
def prepare_c3_params(w_oihw, bias, cout_pad=128):
    """Reshape/transpose/lane-pad the conv parameters ONCE.

    Returns (w_pad, b_pad):
      w_pad : (K, CoutP) = (Cin*KH*KW, 128)  f32, columns [Cout:] are zero
      b_pad : (1, CoutP)                     f32, columns [Cout:] are zero
    The zero padding stays zero through bias+ReLU, so the extra lanes are inert.
    """
    Cout, Cin, KH, KW = w_oihw.shape
    K = Cin * KH * KW
    CoutP = ((Cout + cout_pad - 1) // cout_pad) * cout_pad
    # OIHW row-major flatten -> (Cout, K) with channel-major (cin, kh, kw) feature order,
    # matching conv_general_dilated_patches' output feature ordering.
    w2d = w_oihw.reshape(Cout, K).T                                   # (K, Cout)
    w_pad = jnp.zeros((K, CoutP), w2d.dtype).at[:, :Cout].set(w2d)    # (K, 128)
    b_pad = jnp.zeros((1, CoutP), bias.dtype).at[0, :Cout].set(bias)  # (1, 128)
    return w_pad, b_pad


# ----------------------------------------------------------------------------------
# GEMM dispatch: gridless for small M, parallel M-grid for large M (v7x: 2 TCs).
# ----------------------------------------------------------------------------------
def _c3_gemm(patches2d, w_pad, b_pad, out_dtype, tm=512):
    M, K = patches2d.shape
    CoutP = w_pad.shape[1]

    if M >= 2 * tm and M % tm == 0:
        # Large batch: 1-D parallel grid over M rows.  Weights/bias stay as a single
        # resident block; patch/output tiles are double-buffered by BlockSpec.
        # VMEM per step ~ 2*(tm*K + tm*CoutP)*4 B + 200 KB weights << 32 MiB default.
        return pl.pallas_call(
            gemm_bias_relu_kernel,
            out_shape=jax.ShapeDtypeStruct((M, CoutP), out_dtype),
            grid=(M // tm,),
            in_specs=[
                pl.BlockSpec((tm, K), lambda i: (i, 0)),
                pl.BlockSpec((K, CoutP), lambda i: (0, 0)),
                pl.BlockSpec((1, CoutP), lambda i: (0, 0)),
            ],
            out_specs=pl.BlockSpec((tm, CoutP), lambda i: (i, 0)),
            compiler_params=pltpu.CompilerParams(
                dimension_semantics=("parallel",),
                vmem_limit_bytes=64 * 1024 * 1024,
            ),
        )(patches2d, w_pad, b_pad)

    # Small batch (the M=32 case here): single gridless invocation, everything in VMEM.
    return pl.pallas_call(
        gemm_bias_relu_kernel,
        out_shape=jax.ShapeDtypeStruct((M, CoutP), out_dtype),
        in_specs=[
            pl.BlockSpec(memory_space=pltpu.MemorySpace.VMEM),   # patches (~51 KB)
            pl.BlockSpec(memory_space=pltpu.MemorySpace.VMEM),   # weights (~200 KB)
            pl.BlockSpec(memory_space=pltpu.MemorySpace.VMEM),   # bias
        ],
        out_specs=pl.BlockSpec(memory_space=pltpu.MemorySpace.VMEM),
    )(patches2d, w_pad, b_pad)


# ----------------------------------------------------------------------------------
# Hot-path forward: NCHW input -> lane-dense NHWC(+pad) slab.  No NCHW round trip.
# ----------------------------------------------------------------------------------
@jax.jit
def c3_forward_slab(x_nchw, w_pad, b_pad):
    """Conv2d(16,120,k=5,s=1,p=0) + ReLU.

    Returns the lane-dense slab (N, OH, OW, CoutP=128) -- channels [120:] are zero.
    Downstream stages (pooling / FC) should consume this layout directly; convert to
    NCHW only at the very end of the network via `c3_slab_to_nchw`.
    """
    N, Cin, H, W = x_nchw.shape
    K, CoutP = w_pad.shape
    KH = KW = 5
    OH, OW = H - KH + 1, W - KW + 1
    M = N * OH * OW

    # im2col: (N, OH, OW, Cin*KH*KW), feature order channel-major (cin, kh, kw),
    # matching the OIHW row-major flatten used in prepare_c3_params.
    patches = jax.lax.conv_general_dilated_patches(
        x_nchw, filter_shape=(KH, KW), window_strides=(1, 1), padding="VALID",
        dimension_numbers=("NCHW", "OIHW", "NHWC"))
    patches2d = patches.reshape(M, K)

    out2d = _c3_gemm(patches2d, w_pad, b_pad, x_nchw.dtype)
    return out2d.reshape(N, OH, OW, CoutP)


# Layout glue only -- use at the network boundary if the PyTorch NCHW API is required.
def c3_slab_to_nchw(slab, cout=120):
    return jnp.transpose(slab[..., :cout], (0, 3, 1, 2))


if __name__ == "__main__":
    key = jax.random.PRNGKey(0)
    k_x, k_w, k_b = jax.random.split(key, 3)

    N, Cin, H, W = 2, 16, 8, 8
    Cout, KH, KW = 120, 5, 5

    # Deterministic parameter init mimicking PyTorch Conv2d default:
    # U(-1/sqrt(fan_in), 1/sqrt(fan_in)), fan_in = Cin * KH * KW = 400.
    bound = 1.0 / jnp.sqrt(jnp.float32(Cin * KH * KW))
    w = jax.random.uniform(k_w, (Cout, Cin, KH, KW), jnp.float32, -bound, bound)
    b = jax.random.uniform(k_b, (Cout,), jnp.float32, -bound, bound)
    x = jax.random.normal(k_x, (N, Cin, H, W), jnp.float32)

    # One-time parameter prep (hoisted out of the per-call path); keep device-resident.
    w_pad, b_pad = prepare_c3_params(w, b)
    w_pad, b_pad = jax.block_until_ready((w_pad, b_pad))

    # Hot path: returns the lane-dense (N, OH, OW, 128) slab.
    slab = c3_forward_slab(x, w_pad, b_pad)
    slab = jax.block_until_ready(slab)

    # PyTorch-equivalent NCHW view for the correctness check (boundary-only conversion).
    out = c3_slab_to_nchw(slab, Cout)

    # Cross-check against XLA's native convolution (same NCHW/OIHW semantics).
    ref = jax.lax.conv_general_dilated(
        x, w, window_strides=(1, 1), padding="VALID",
        dimension_numbers=("NCHW", "OIHW", "NCHW"))
    ref = jnp.maximum(ref + b[None, :, None, None], 0.0)

    assert slab.shape == (N, H - KH + 1, W - KW + 1, 128)
    assert out.shape == (N, Cout, H - KH + 1, W - KW + 1)
    assert jnp.allclose(out, ref, atol=1e-4, rtol=1e-4)
    # Padded lanes must stay exactly zero (zero weights + zero bias through ReLU).
    assert jnp.all(slab[..., Cout:] == 0.0)

    print("KERNEL_OK")
</pallas_src>

<mosaic_0001>
module attributes {stable_mosaic.version = 11 : i64} {
  func.func @gemm_bias_relu_kernel(%arg0: memref<32x400xf32, #tpu.memory_space<vmem>>, %arg1: memref<400x128xf32, #tpu.memory_space<vmem>>, %arg2: memref<1x128xf32, #tpu.memory_space<vmem>>, %arg3: memref<32x128xf32, #tpu.memory_space<vmem>>) attributes {dimension_semantics = [], scalar_prefetch = 0 : i64, scratch_operands = 0 : i64, tpu.core_type = #tpu.core_type<tc>} {
    %c0 = arith.constant 0 : index
    %c0_0 = arith.constant 0 : index
    %0 = vector.load %arg0[%c0, %c0_0] : memref<32x400xf32, #tpu.memory_space<vmem>>, vector<32x400xf32>
    %c0_1 = arith.constant 0 : index
    %c0_2 = arith.constant 0 : index
    %1 = vector.load %arg1[%c0_1, %c0_2] : memref<400x128xf32, #tpu.memory_space<vmem>>, vector<400x128xf32>
    %cst = arith.constant dense<0.000000e+00> : vector<32x128xf32>
    %2 = tpu.matmul %0, %1, %cst {dimension_numbers = #tpu.dot_dimension_numbers<[1], [0], [0], [1], [0, 0, 1, 1], [], []>} : vector<32x400xf32>, vector<400x128xf32>, vector<32x128xf32> -> vector<32x128xf32>
    %c0_3 = arith.constant 0 : index
    %c0_4 = arith.constant 0 : index
    %3 = vector.load %arg2[%c0_3, %c0_4] : memref<1x128xf32, #tpu.memory_space<vmem>>, vector<1x128xf32>
    %4 = vector.broadcast %3 : vector<1x128xf32> to vector<32x128xf32>
    %5 = arith.addf %2, %4 : vector<32x128xf32>
    %cst_5 = arith.constant 0.000000e+00 : f32
    %6 = vector.broadcast %cst_5 : f32 to vector<32x128xf32>
    %7 = arith.maximumf %5, %6 : vector<32x128xf32>
    %c0_6 = arith.constant 0 : index
    %c0_7 = arith.constant 0 : index
    %8 = vector.load %arg3[%c0_6, %c0_7] : memref<32x128xf32, #tpu.memory_space<vmem>>, vector<32x128xf32>
    tpu.vector_store %arg3[%c0_6, %c0_7], %7 {strides = array<i32>} : memref<32x128xf32, #tpu.memory_space<vmem>>, vector<32x128xf32>,
    return
  }
}

</mosaic_0001>

<bundles_post_ra>
// kernel: c3_forward_slab.1
= control target key start
LH: loop header
LB: loop body
LE: loop exit
PB: predicated region body
PF: predicated region fallthrough
CT: control target
= control target key end

     0   :  { %v431_v4 = vmov 0.0|0.0   ;;  %vm88_vm0 = vcmask 130048   ;;  %s681_s0 = inlined_call_operand.vmem [shape: f32[32,400], index: 0, kind: input, shape index: {}]   ;;  %s682_s1 = inlined_call_operand.vmem [shape: f32[400,128], index: 1, kind: input, shape index: {}]   ;;  %s683_s2 = inlined_call_operand.vmem [shape: f32[1,128], index: 2, kind: input, shape index: {}]   ;;  %s684_s3 = inlined_call_operand.hbm [shape: f32[32,128], index: 3, kind: output, shape index: {}]  }
   0x1   :  { %v47_v0 = vld [vmem:[%s682_s1 + $0x80] sm:$0xff]  ;;  %v48_v1 = vld [vmem:[%s682_s1 + $0x88] sm:$0xff]  ;;  %376 = vmatprep.subr.bf16.mxu1 %v431_v4  ;;  %v49_v10 = vld [vmem:[%s682_s1 + $0x90] sm:$0xff] }
   0x2   :  { %v31_v2 = vld [vmem:[%s682_s1] sm:$0xff]  ;;  %v344_v3 = vpack.c.bf16 %v48_v1, %v47_v0  ;;  %v32_v5 = vld [vmem:[%s682_s1 + $0x8] sm:$0xff]  ;;  %v50_v11 = vld [vmem:[%s682_s1 + $0x98] sm:$0xff] }
   0x3   :  { %v63_v6 = vld [vmem:[%s682_s1 + $0x100] sm:$0xff]  ;;  %v64_v7 = vld [vmem:[%s682_s1 + $0x108] sm:$0xff]  ;;  %v346_v8 = vpack.c.bf16 %v32_v5, %v31_v2  ;;  %v33_v12 = vld [vmem:[%s682_s1 + $0x10] sm:$0xff]  ;;  %v348_v13 = vpack.c.bf16 %v50_v11, %v49_v10 }
   0x4   :  { %v377_v9 = vpack.c.bf16 %v64_v7, %v63_v6  ;;  %345 = vmatprep.subr.bf16.mxu0 %v344_v3  ;;  %v34_v14 = vld [vmem:[%s682_s1 + $0x18] sm:$0xff]  ;;  %v65_v15 = vld [vmem:[%s682_s1 + $0x110] sm:$0xff]  ;;  %v51_v19 = vld [vmem:[%s682_s1 + $0xa0] sm:$0xff] }
   0x5   :  { %v66_v16 = vld [vmem:[%s682_s1 + $0x118] sm:$0xff]  ;;  %347 = vmatpush3.bf16.msra.mxu0 %v346_v8  ;;  %v350_v17 = vpack.c.bf16 %v34_v14, %v33_v12  ;;  %v52_v20 = vld [vmem:[%s682_s1 + $0xa8] sm:$0xff]  ;;  %v35_v21 = vld [vmem:[%s682_s1 + $0x20] sm:$0xff] }
   0x6   :  { %378 = vmatpush1.bf16.msra.mxu1 %v377_v9  ;;  %v380_v18 = vpack.c.bf16 %v66_v16, %v65_v15  ;;  %349 = vmatprep.subr.bf16.mxu0 %v348_v13  ;;  %v352_v22 = vpack.c.bf16 %v52_v20, %v51_v19  ;;  %v36_v23 = vld [vmem:[%s682_s1 + $0x28] sm:$0xff]  ;;  %v67_v24 = vld [vmem:[%s682_s1 + $0x120] sm:$0xff]  ;;  %v53_v26 = vld [vmem:[%s682_s1 + $0xb0] sm:$0xff] }
   0x7   :  { %379 = vmatprep.subr.bf16.mxu1 %v431_v4  ;;  %v68_v25 = vld [vmem:[%s682_s1 + $0x128] sm:$0xff]  ;;  %v54_v27 = vld [vmem:[%s682_s1 + $0xb8] sm:$0xff]  ;;  %v354_v28 = vpack.c.bf16 %v36_v23, %v35_v21  ;;  %v37_v30 = vld [vmem:[%s682_s1 + $0x30] sm:$0xff] }
   0x8   :  { %v383_v29 = vpack.c.bf16 %v68_v25, %v67_v24  ;;  %v356_v31 = vpack.c.bf16 %v54_v27, %v53_v26  ;;  %v38_v32 = vld [vmem:[%s682_s1 + $0x38] sm:$0xff]  ;;  %v69_v33 = vld [vmem:[%s682_s1 + $0x130] sm:$0xff]  ;;  %v55_v35 = vld [vmem:[%s682_s1 + $0xc0] sm:$0xff] }
   0x9   :  { %351 = vmatpush3.bf16.msra.mxu0 %v350_v17  ;;  %v70_v34 = vld [vmem:[%s682_s1 + $0x138] sm:$0xff]  ;;  %v56_v36 = vld [vmem:[%s682_s1 + $0xc8] sm:$0xff]  ;;  %v358_v37 = vpack.c.bf16 %v38_v32, %v37_v30  ;;  %v39_v39 = vld [vmem:[%s682_s1 + $0x40] sm:$0xff] }
   0xa   :  { %381 = vmatpush1.bf16.msra.mxu1 %v380_v18  ;;  %353 = vmatprep.subr.bf16.mxu0 %v352_v22  ;;  %v386_v38 = vpack.c.bf16 %v70_v34, %v69_v33  ;;  %v360_v40 = vpack.c.bf16 %v56_v36, %v55_v35  ;;  %v40_v41 = vld [vmem:[%s682_s1 + $0x48] sm:$0xff]  ;;  %v71_v42 = vld [vmem:[%s682_s1 + $0x140] sm:$0xff]  ;;  %v57_v44 = vld [vmem:[%s682_s1 + $0xd0] sm:$0xff] }
   0xb   :  { %382 = vmatprep.subr.bf16.mxu1 %v431_v4  ;;  %v72_v43 = vld [vmem:[%s682_s1 + $0x148] sm:$0xff]  ;;  %v58_v45 = vld [vmem:[%s682_s1 + $0xd8] sm:$0xff]  ;;  %v362_v46 = vpack.c.bf16 %v40_v41, %v39_v39  ;;  %v41_v48 = vld [vmem:[%s682_s1 + $0x50] sm:$0xff] }
   0xc   :  { %v389_v47 = vpack.c.bf16 %v72_v43, %v71_v42  ;;  %v42_v49 = vld [vmem:[%s682_s1 + $0x58] sm:$0xff]  ;;  %v16_v50 = vld [vmem:[%s681_s0 + $0x8] sm:$0xff]  ;;  %v364_v51 = vpack.c.bf16 %v58_v45, %v57_v44  ;;  %v73_v52 = vld [vmem:[%s682_s1 + $0x150] sm:$0xff] }
   0xd   :  { %355 = vmatpush3.bf16.msra.mxu0 %v354_v28  ;;  %v74_v53 = vld [vmem:[%s682_s1 + $0x158] sm:$0xff]  ;;  %v59_v55 = vld [vmem:[%s682_s1 + $0xe0] sm:$0xff]  ;;  %v60_v56 = vld [vmem:[%s682_s1 + $0xe8] sm:$0xff]  ;;  %165 = vmatprep.mubr.f32.mxu0 %v16_v50  ;;  %v366_v57 = vpack.c.bf16 %v42_v49, %v41_v48 }
   0xe   :  { %384 = vmatpush1.bf16.msra.mxu1 %v383_v29  ;;  %357 = vmatprep.subr.bf16.mxu0 %v356_v31  ;;  %v18_v54 = vld [vmem:[%s681_s0 + $0x18] sm:$0xff]  ;;  %v392_v58 = vpack.c.bf16 %v74_v53, %v73_v52  ;;  %v43_v59 = vld [vmem:[%s682_s1 + $0x60] sm:$0xff]  ;;  %v368_v60 = vpack.c.bf16 %v60_v56, %v59_v55  ;;  %v44_v61 = vld [vmem:[%s682_s1 + $0x68] sm:$0xff] }
   0xf   :  { %385 = vmatprep.subr.bf16.mxu1 %v431_v4  ;;  %296 = vmatprep.mubr.msk.f32.mxu1 %vm88_vm0, %v18_v54  ;;  %v75_v62 = vld [vmem:[%s682_s1 + $0x160] sm:$0xff]  ;;  %v76_v63 = vld [vmem:[%s682_s1 + $0x168] sm:$0xff]  ;;  %v61_v0 = vld [vmem:[%s682_s1 + $0xf0] sm:$0xff] }
  0x10   :  { %v62_v1 = vld [vmem:[%s682_s1 + $0xf8] sm:$0xff] }
  0x11   :  { %359 = vmatpush3.bf16.msra.mxu0 %v358_v37 }
  0x12   :  { %387 = vmatpush1.bf16.msra.mxu1 %v386_v38  ;;  %361 = vmatprep.subr.bf16.mxu0 %v360_v40 }
  0x13   :  { %388 = vmatprep.subr.bf16.mxu1 %v431_v4 }
  0x15   :  { %363 = vmatpush3.bf16.msra.mxu0 %v362_v46 }
  0x16   :  { %390 = vmatpush1.bf16.msra.mxu1 %v389_v47  ;;  %365 = vmatprep.subr.bf16.mxu0 %v364_v51 }
  0x17   :  { %391 = vmatprep.subr.bf16.mxu1 %v431_v4 }
  0x18   :  { %8 = vsyncpa [#allocation3], 0  ;;  %v370_v2 = vpack.c.bf16 %v44_v61, %v43_v59  ;;  %v395_v3 = vpack.c.bf16 %v76_v63, %v75_v62  ;;  %v45_v5 = vld [vmem:[%s682_s1 + $0x70] sm:$0xff]  ;;  %v372_v6 = vpack.c.bf16 %v62_v1, %v61_v0  ;;  %v46_v7 = vld [vmem:[%s682_s1 + $0x78] sm:$0xff] }
  0x19   :  { %367 = vmatpush3.bf16.msra.mxu0 %v366_v57  ;;  %v77_v8 = vld [vmem:[%s682_s1 + $0x170] sm:$0xff]  ;;  %v78_v9 = vld [vmem:[%s682_s1 + $0x178] sm:$0xff]  ;;  %v374_v10 = vpack.c.bf16 %v46_v7, %v45_v5  ;;  %v79_v12 = vld [vmem:[%s682_s1 + $0x180] sm:$0xff] }
  0x1a   :  { %393 = vmatpush1.bf16.msra.mxu1 %v392_v58  ;;  %369 = vmatprep.subr.bf16.mxu0 %v368_v60  ;;  %v398_v11 = vpack.c.bf16 %v78_v9, %v77_v8  ;;  %v80_v13 = vld [vmem:[%s682_s1 + $0x188] sm:$0xff]  ;;  %v15_v14 = vld [vmem:[%s681_s0] sm:$0xff]  ;;  %v17_v18 = vld [vmem:[%s681_s0 + $0x10] sm:$0xff] }
  0x1b   :  { %394 = vmatprep.subr.bf16.mxu1 %v431_v4  ;;  %v401_v15 = vpack.c.bf16 %v80_v13, %v79_v12  ;;  %v20_v16 = vld [vmem:[%s681_s0 + $0x28] sm:$0xff]  ;;  %v19_v17 = vld [vmem:[%s681_s0 + $0x20] sm:$0xff]  ;;  %v21_v21 = vld [vmem:[%s681_s0 + $0x30] sm:$0xff] }
  0x1c   :  { %v24_v19 = vld [vmem:[%s681_s0 + $0x48] sm:$0xff]  ;;  %v23_v20 = vld [vmem:[%s681_s0 + $0x40] sm:$0xff]  ;;  %v26_v23 = vld [vmem:[%s681_s0 + $0x58] sm:$0xff] }
  0x1d   :  { %371 = vmatpush3.bf16.msra.mxu0 %v370_v2  ;;  %v28_v22 = vld [vmem:[%s681_s0 + $0x68] sm:$0xff]  ;;  %v27_v24 = vld [vmem:[%s681_s0 + $0x60] sm:$0xff]  ;;  %v25_v25 = vld [vmem:[%s681_s0 + $0x50] sm:$0xff] }
  0x1e   :  { %396 = vmatpush1.bf16.msra.mxu1 %v395_v3  ;;  %373 = vmatprep.subr.bf16.mxu0 %v372_v6  ;;  %v30_v26 = vld [vmem:[%s681_s0 + $0x78] sm:$0xff]  ;;  %v29_v27 = vld [vmem:[%s681_s0 + $0x70] sm:$0xff]  ;;  %v295_v30 = vld [vmem:[%s683_s2] ss:$0 sm:$0xff] }
  0x1f   :  { %397 = vmatprep.subr.bf16.mxu1 %v431_v4 }
  0x21   :  { %375 = vmatpush3.bf16.msra.mxu0 %v374_v10 }
  0x22   :  { %399 = vmatpush1.bf16.msra.mxu1 %v398_v11 }
  0x23   :  { %400 = vmatprep.subr.bf16.mxu1 %v431_v4  ;;  %v22_v4 = vld [vmem:[%s681_s0 + $0x38] sm:$0xff]  ;;  %s432_s0 = smov [#allocation2]  }
  0x24   :  { %166 = vmatmul.mubr.f32.vlgmr.msra.gmra.mrb[0].mxu0 %v15_v14  ;;  %s284_s2 = sshll.u32 %s432_s0, 4  ;;  %s285_s2 = int_to_ptr.vmem [resolvable:$true] %s284_s2 }
  0x25   :  { %170 = vmatprep.mubr.f32.mxu0 %v20_v16  ;;  %s407_s10 = scalar_lea.vmem %s285_s2, 512  ;;  %p412_p1 = scmp.lt.s32.totalorder %s285_s2, %s285_s2 }
  0x26   :  { %402 = vmatpush1.bf16.msra.mxu1 %v401_v15  ;;  %p408_p0 = scmp.ne.s32.totalorder %s285_s2, %s407_s10  ;;  %p413_p2 = scmp.lt.s32.totalorder %s407_s10, %s407_s10 }
  0x28   :  { %171 = vmatmul.mubr.f32.gmra.mrb[2].mxu0 %v19_v17  ;;  %p414_p3 = por %p413_p2, %p412_p1 }
  0x29   :  { %251 = vmatmul.mubr.f32.vlgmr.msra.gmra.mrb[0].mxu1 %v17_v18  ;;  %175 = vmatprep.mubr.f32.mxu0 %v24_v19 }
  0x2a   :  { %297 = vmatprep.mubr.msk.f32.mxu1 %vm88_vm0, %v22_v4  ;;  %p415_p4 = pnand %p414_p3, %p408_p0 }
  0x2c   :  { %176 = vmatmul.mubr.f32.gmra.mrb[4].mxu0 %v23_v20 }
  0x2d   :  { %256 = vmatmul.mubr.f32.gmra.mrb[2].mxu1 %v21_v21  ;;  %180 = vmatprep.mubr.f32.mxu0 %v28_v22 }
  0x2e   :  { %298 = vmatprep.mubr.msk.f32.mxu1 %vm88_vm0, %v26_v23 }
  0x30   :  { %181 = vmatmul.mubr.f32.gmra.mrb[6].mxu0 %v27_v24 }
  0x31   :  { %261 = vmatmul.mubr.f32.gmra.mrb[4].mxu1 %v25_v25 }
  0x32   :  { %299 = vmatprep.mubr.msk.f32.mxu1 %vm88_vm0, %v30_v26 }
  0x35   :  { %266 = vmatmul.mubr.f32.gmra.mrb[6].mxu1 %v29_v27 }
  0xf7   :  { %v332_v28 = vpop.f32.mrb[0].mxu0 }
  0xf8   :  { %v333_v29 = vpop.f32.mrb[1].mxu0 }
  0xf9   :  { %v334_v31 = vadd.f32 %v333_v29, %v332_v28 }
  0xfb   :  { %v335_v32 = vpop.f32.mrb[2].mxu0  ;;  %v168_v33 = vadd.f32 %v334_v31, %v295_v30 }
  0xfc   :  { %v252_v34 = vpop.f32.mrb[0].mxu1  ;;  %v336_v35 = vpop.f32.mrb[3].mxu0 }
  0xfd   :  { %v254_v36 = vpop.f32.mrb[1].mxu1  ;;  %v253_v37 = vadd.f32 %v252_v34, %v168_v33  ;;  %v337_v38 = vadd.f32 %v336_v35, %v335_v32 }
  0xff   :  { %v271_v39 = vmax.f32 %v253_v37, 0.0  ;;  %v338_v40 = vpop.f32.mrb[4].mxu0  ;;  %v173_v41 = vadd.f32 %v337_v38, %v295_v30 }
 0x100   :  { %v257_v42 = vpop.f32.mrb[2].mxu1  ;;  %v339_v43 = vpop.f32.mrb[5].mxu0 }
 0x101   :  { %v259_v44 = vpop.f32.mrb[3].mxu1  ;;  %275 = vst [vmem:[#allocation2] sm:$0xff] %v271_v39  ;;  %v258_v45 = vadd.f32 %v257_v42, %v173_v41  ;;  %v340_v46 = vadd.f32 %v339_v43, %v338_v40 }
 0x103   :  { %v272_v47 = vmax.f32 %v258_v45, 0.0  ;;  %v341_v48 = vpop.f32.mrb[6].mxu0  ;;  %v178_v49 = vadd.f32 %v340_v46, %v295_v30 }
 0x104   :  { %v262_v50 = vpop.f32.mrb[4].mxu1  ;;  %v342_v51 = vpop.f32.mrb[7].mxu0 }
 0x105   :  { %v264_v52 = vpop.f32.mrb[5].mxu1  ;;  %276 = vst [vmem:[#allocation2 + $0x8] sm:$0xff] %v272_v47  ;;  %v263_v53 = vadd.f32 %v262_v50, %v178_v49  ;;  %v343_v54 = vadd.f32 %v342_v51, %v341_v48 }
 0x107   :  { %v273_v55 = vmax.f32 %v263_v53, 0.0  ;;  %v183_v56 = vadd.f32 %v343_v54, %v295_v30 }
 0x108   :  { %v267_v57 = vpop.f32.mrb[6].mxu1 }
 0x109   :  { %v269_v58 = vpop.f32.mrb[7].mxu1  ;;  %277 = vst [vmem:[#allocation2 + $0x10] sm:$0xff] %v273_v55  ;;  %v268_v59 = vadd.f32 %v267_v57, %v183_v56 }
 0x10b   :  { %v274_v60 = vmax.f32 %v268_v59, 0.0 }
 0x10d   :  { %278 = vst [vmem:[#allocation2 + $0x18] sm:$0xff] %v274_v60 }
 0x10e   :  { %418 = shalt.err (!%p415_p4)
}
 0x10f   :  { %s419_s13 = scalar_lea.hbm %s684_s3, 512 }
 0x110   :  { %p420_p5 = scmp.ne.s32.totalorder %s684_s3, %s419_s13  ;;  %p423_p6 = scmp.lt.u32.totalorder %s419_s13, %s684_s3 }
 0x112   :  { %p425_p7 = pnand %p423_p6, %p420_p5 }
 0x114   :  { %428 = shalt.err (!%p425_p7)
}
 0x115   :  { %s433_s17 = smov 128   ;;  %s434_s18 = smov 8  }
 0x116   :  { %290 = dma.vmem_to_hbm [thread:$0]  %s285_s2, 512, %s684_s3, [#allocation3], %s433_s17, %s433_s17, %s434_s18  }
 0x117   :  { %429 = dma.done.wait [#allocation3], 512  }
 0x118   :  { %430 = vsyncadd [#allocation3], 4294966784 }
 0x119   :  { %294 = vsyncpa [#allocation3], 1 }

</bundles_post_ra>
